<compile_context>
chip_gen: v7x
topology: tpu7x:2x2x1
jax: 0.10.0
libtpu: 0.0.40
codegen_flags: <defaults>
</compile_context>

<pallas_src>
import functools

import numpy as np
import jax
import jax.numpy as jnp
from jax.experimental import pallas as pl
from jax.experimental.pallas import tpu as pltpu

NEG_INF = -1e30        # masked-logit value
MASK_GUARD = -1e20     # finite floor for the running max: exp(NEG_INF - MASK_GUARD) == 0 exactly
LEAKY_SLOPE = 0.2


def _proj_kernel(x_ref, w_ref, o_ref):
    """One lane-dense MXU pass: [TILE, C_in] @ [C_in, C_out_pad] (C_out_pad % 128 == 0)."""
    o_ref[...] = jnp.dot(x_ref[...], w_ref[...], preferred_element_type=jnp.float32)


def _attn_kernel(sched_ref, cnt_ref, adst_ref, asrc_ref, xw_ref, adj_ref, bias_ref,
                 o_ref, m_scr, l_scr, acc_scr, *, heads, out_ch):
    """Flash-style masked GAT attention over (dst tile, scheduled nonzero src tile)."""
    i = pl.program_id(0)
    j = pl.program_id(1)

    @pl.when(j == 0)
    def _init():
        m_scr[...] = jnp.full_like(m_scr, MASK_GUARD)
        l_scr[...] = jnp.zeros_like(l_scr)
        acc_scr[...] = jnp.zeros_like(acc_scr)

    @pl.when(j < cnt_ref[i])          # skip padded schedule entries entirely
    def _update():
        adj_bool = adj_ref[...] != 0                      # one shared compare per tile
        ad = adst_ref[...]                                # [TD, H]  f32
        asr = asrc_ref[...]                               # [H, TS]  f32 ([H,N] layout: no transpose)
        xw = xw_ref[...]                                  # [TS, H*F] feature dtype (bf16/f32)

        # per-head masked logits + row maxima (kept alive; fine for small H, TS<=512)
        e_heads, mx_cols = [], []
        for h in range(heads):
            e = ad[:, h:h + 1] + asr[h:h + 1, :]          # [TD, TS]
            e = jnp.maximum(e, LEAKY_SLOPE * e)           # LeakyReLU (slope < 1)
            e = jnp.where(adj_bool, e, NEG_INF)           # single select masks
            e_heads.append(e)
            mx_cols.append(jnp.max(e, axis=-1, keepdims=True))

        # online-softmax stats, updated once per tile (vectorized over heads)
        m_prev = m_scr[...]                               # [TD, H]
        m_new = jnp.maximum(m_prev, jnp.concatenate(mx_cols, axis=-1))
        corr = jnp.exp(m_prev - m_new)
        m_scr[...] = m_new

        sum_cols = []
        for h in range(heads):
            f0 = h * out_ch
            # masked entries: exp(NEG_INF - m_new) underflows to exactly 0 (m_new >= MASK_GUARD)
            p = jnp.exp(e_heads[h] - m_new[:, h:h + 1])   # [TD, TS]
            sum_cols.append(jnp.sum(p, axis=-1, keepdims=True))
            acc_scr[:, f0:f0 + out_ch] = (
                corr[:, h:h + 1] * acc_scr[:, f0:f0 + out_ch]
                + jnp.dot(p.astype(xw.dtype), xw[:, f0:f0 + out_ch],
                          preferred_element_type=jnp.float32))
        l_scr[...] = corr * l_scr[...] + jnp.concatenate(sum_cols, axis=-1)

    @pl.when(j == pl.num_programs(1) - 1)
    def _finalize():
        # exact reciprocal is O(TD*H) -> essentially free; avoids approx-EUP error
        inv = pl.reciprocal(l_scr[...], approx=False)     # [TD, H]
        cols = []
        for h in range(heads):
            f0 = h * out_ch
            cols.append(acc_scr[:, f0:f0 + out_ch] * inv[:, h:h + 1])
        out = jnp.concatenate(cols, axis=-1) + bias_ref[...]
        # ELU with overflow-safe exp; one store per dst tile
        o_ref[...] = jnp.where(out > 0, out, jnp.exp(jnp.minimum(out, 0.0)) - 1.0)


def gat_forward(x, edge_index, w, a_src, a_dst, bias, *, heads, out_ch,
                tile_dst=256, tile_src=256, feature_dtype=jnp.bfloat16):
    """x: [N, C_in] f32, edge_index: [2, E] int32 (row 0 = src, row 1 = dst)."""
    n, c_in = x.shape
    hf = heads * out_ch

    step = int(np.lcm(tile_dst, tile_src))
    n_pad = ((n + step - 1) // step) * step

    # ---- glue: augmented weight folding the alpha projections into one matmul,
    #      padded to a 128-multiple column count so the stage-1 store is lane-dense.
    rows = np.arange(hf)
    cols = np.repeat(np.arange(heads), out_ch)
    asrc_mat = jnp.zeros((hf, heads), jnp.float32).at[rows, cols].set(a_src.reshape(-1))
    adst_mat = jnp.zeros((hf, heads), jnp.float32).at[rows, cols].set(a_dst.reshape(-1))
    w_aug = jnp.concatenate([w, w @ asrc_mat, w @ adst_mat], axis=1)      # [C_in, HF+2H]
    c_out = hf + 2 * heads
    c_out_pad = ((c_out + 127) // 128) * 128
    w_aug_pad = jnp.zeros((c_in, c_out_pad), jnp.float32).at[:, :c_out].set(w_aug)

    x_pad = jnp.zeros((n_pad, c_in), jnp.float32).at[:n, :].set(x)

    # ---- stage 1: projection, big row tiles, single lane-dense output ----------------
    if n_pad <= 1024:
        proj_tile = n_pad
    else:
        proj_tile = step
        for cand in (1024, 512, 256):
            if n_pad % cand == 0:
                proj_tile = cand
                break

    proj = pl.pallas_call(
        _proj_kernel,
        out_shape=jax.ShapeDtypeStruct((n_pad, c_out_pad), jnp.float32),
        grid=(n_pad // proj_tile,),
        in_specs=[pl.BlockSpec((proj_tile, c_in), lambda i: (i, 0)),
                  pl.BlockSpec((c_in, c_out_pad), lambda i: (0, 0))],
        out_specs=pl.BlockSpec((proj_tile, c_out_pad), lambda i: (i, 0)),
        compiler_params=pltpu.CompilerParams(dimension_semantics=("parallel",)),
    )(x_pad, w_aug_pad)

    xw = proj[:, :hf].astype(feature_dtype)               # dominant re-streamed array (bf16 on v6e/v7x)
    alpha_src_t = proj[:, hf:hf + heads].T                 # [H, N_pad] layout, f32 logits
    alpha_dst = proj[:, hf + heads:hf + 2 * heads]         # [N_pad, H] f32 logits

    # ---- glue: dense int8 adjacency with self-loops (adj[i, j] = 1 iff edge j -> i) --
    src, dst = edge_index[0], edge_index[1]
    adj = jnp.zeros((n_pad, n_pad), jnp.int8)
    adj = adj.at[dst, src].set(1)
    diag = jnp.arange(n_pad)
    adj = adj.at[diag, diag].set(1)                        # add_self_loops=True (padded rows too)

    bias2d = bias.reshape(1, hf).astype(jnp.float32)

    # ---- host-side schedule: per dst tile, the list of nonzero src tiles --------------
    n_dst_tiles = n_pad // tile_dst
    src_np = np.asarray(src)
    dst_np = np.asarray(dst)
    rows_np = np.arange(n_pad)
    all_dt = np.concatenate([dst_np // tile_dst, rows_np // tile_dst])
    all_st = np.concatenate([src_np // tile_src, rows_np // tile_src])
    tile_lists, counts = [], []
    for t in range(n_dst_tiles):
        s = np.unique(all_st[all_dt == t])                 # >= 1 entry (self-loop tile)
        tile_lists.append(s)
        counts.append(len(s))
    max_cnt = max(counts)
    sched_np = np.zeros((n_dst_tiles, max_cnt), np.int32)
    for t, s in enumerate(tile_lists):
        sched_np[t, :len(s)] = s
        sched_np[t, len(s):] = s[-1]                       # pad with last valid -> no extra DMA
    sched = jnp.asarray(sched_np)
    cnt = jnp.asarray(np.asarray(counts, np.int32))

    # ---- stage 2: flash-style masked attention over scheduled nonzero src tiles -------
    out_pad = pl.pallas_call(
        functools.partial(_attn_kernel, heads=heads, out_ch=out_ch),
        out_shape=jax.ShapeDtypeStruct((n_pad, hf), jnp.float32),
        grid_spec=pltpu.PrefetchScalarGridSpec(
            num_scalar_prefetch=2,
            grid=(n_dst_tiles, max_cnt),
            in_specs=[
                pl.BlockSpec((tile_dst, heads), lambda i, j, s, c: (i, 0)),        # alpha_dst
                pl.BlockSpec((heads, tile_src), lambda i, j, s, c: (0, s[i, j])),  # alpha_src (H,N)
                pl.BlockSpec((tile_src, hf), lambda i, j, s, c: (s[i, j], 0)),     # xw (src values)
                pl.BlockSpec((tile_dst, tile_src), lambda i, j, s, c: (i, s[i, j])),  # int8 adjacency
                pl.BlockSpec((1, hf), lambda i, j, s, c: (0, 0)),                  # bias
            ],
            out_specs=pl.BlockSpec((tile_dst, hf), lambda i, j, s, c: (i, 0)),
            scratch_shapes=[
                pltpu.VMEM((tile_dst, heads), jnp.float32),   # running max per head
                pltpu.VMEM((tile_dst, heads), jnp.float32),   # running softmax denominator
                pltpu.VMEM((tile_dst, hf), jnp.float32),      # output accumulator
            ]),
        compiler_params=pltpu.CompilerParams(
            dimension_semantics=("parallel", "arbitrary")),
    )(sched, cnt, alpha_dst, alpha_src_t, xw, adj, bias2d)

    return out_pad[:n]


def gat_reference(x, edge_index, w, a_src, a_dst, bias, *, heads, out_ch):
    """Pure-JAX dense reference of the same math (for correctness check)."""
    n = x.shape[0]
    src, dst = edge_index[0], edge_index[1]
    adj = jnp.zeros((n, n), jnp.float32).at[dst, src].set(1.0)
    adj = adj.at[jnp.arange(n), jnp.arange(n)].set(1.0)

    xw = x @ w
    xwr = xw.reshape(n, heads, out_ch)
    a_s = jnp.einsum("nhf,hf->nh", xwr, a_src)
    a_d = jnp.einsum("nhf,hf->nh", xwr, a_dst)
    e = a_d[:, None, :] + a_s[None, :, :]                 # [N_dst, N_src, H]
    e = jnp.where(e > 0, e, LEAKY_SLOPE * e)
    e = jnp.where(adj[:, :, None] > 0, e, NEG_INF)
    e = e - jnp.max(e, axis=1, keepdims=True)
    p = jnp.exp(e)
    attn = p / jnp.sum(p, axis=1, keepdims=True)
    out = jnp.einsum("ijh,jhf->ihf", attn, xwr).reshape(n, heads * out_ch) + bias
    return jnp.where(out > 0, out, jnp.exp(jnp.minimum(out, 0.0)) - 1.0)


if __name__ == "__main__":
    # N=300 pads to 512 -> 2 dst tiles x up to 2 scheduled src tiles at the 256x256
    # default, exercising the online-softmax multi-tile path and both v7x TensorCores.
    N, C_IN, OUT_CH, HEADS = 300, 8, 8, 2
    key = jax.random.PRNGKey(0)
    k_x, k_w, k_as, k_ad, k_b = jax.random.split(key, 5)

    x = jax.random.normal(k_x, (N, C_IN), jnp.float32)
    w = jax.random.normal(k_w, (C_IN, HEADS * OUT_CH), jnp.float32) * 0.2
    a_src = jax.random.normal(k_as, (HEADS, OUT_CH), jnp.float32) * 0.2
    a_dst = jax.random.normal(k_ad, (HEADS, OUT_CH), jnp.float32) * 0.2
    bias = jax.random.normal(k_b, (HEADS * OUT_CH,), jnp.float32) * 0.1

    # deterministic graph: ring edges + skip-3 edges (no duplicates)
    idx = np.arange(N)
    src = np.concatenate([idx, idx]).astype(np.int32)
    dst = np.concatenate([(idx + 1) % N, (idx + 3) % N]).astype(np.int32)
    edge_index = jnp.asarray(np.stack([src, dst], axis=0))              # [2, E]

    ref = gat_reference(x, edge_index, w, a_src, a_dst, bias, heads=HEADS, out_ch=OUT_CH)

    # f32 feature path: tight check against the f32 reference.
    out_f32 = gat_forward(x, edge_index, w, a_src, a_dst, bias,
                          heads=HEADS, out_ch=OUT_CH, feature_dtype=jnp.float32)
    out_f32 = jax.block_until_ready(out_f32)
    assert out_f32.shape == (N, HEADS * OUT_CH)
    np.testing.assert_allclose(np.asarray(out_f32), np.asarray(ref), rtol=2e-3, atol=2e-3)

    # bf16 feature path (default; recommended on v6e/v7x): looser tolerance for bf16 xw/p.
    out_bf16 = gat_forward(x, edge_index, w, a_src, a_dst, bias,
                           heads=HEADS, out_ch=OUT_CH, feature_dtype=jnp.bfloat16)
    out_bf16 = jax.block_until_ready(out_bf16)
    assert out_bf16.shape == (N, HEADS * OUT_CH)
    np.testing.assert_allclose(np.asarray(out_bf16), np.asarray(ref), rtol=3e-2, atol=3e-2)

    print("KERNEL_OK")
</pallas_src>

<mosaic_0001>
module attributes {stable_mosaic.version = 11 : i64} {
  func.func @_proj_kernel(%arg0: i32, %arg1: memref<512x8xf32, #tpu.memory_space<vmem>>, %arg2: memref<8x128xf32, #tpu.memory_space<vmem>>, %arg3: memref<512x128xf32, #tpu.memory_space<vmem>>) attributes {dimension_semantics = [#tpu.dimension_semantics<parallel>], iteration_bounds = array<i64: 1>, scalar_prefetch = 0 : i64, scratch_operands = 0 : i64, tpu.core_type = #tpu.core_type<tc>, window_params = [{transform_indices = @transform_0, window_bounds = array<i64: 512, 8>}, {pipeline_mode = #tpu.pipeline_mode<synchronous>, transform_indices = @transform_1, window_bounds = array<i64: 8, 128>}, {transform_indices = @transform_2, window_bounds = array<i64: 512, 128>}]} {
    %c0 = arith.constant 0 : index
    %c0_0 = arith.constant 0 : index
    %0 = vector.load %arg1[%c0, %c0_0] : memref<512x8xf32, #tpu.memory_space<vmem>>, vector<512x8xf32>
    %c0_1 = arith.constant 0 : index
    %c0_2 = arith.constant 0 : index
    %1 = vector.load %arg2[%c0_1, %c0_2] : memref<8x128xf32, #tpu.memory_space<vmem>>, vector<8x128xf32>
    %cst = arith.constant dense<0.000000e+00> : vector<512x128xf32>
    %2 = tpu.matmul %0, %1, %cst {dimension_numbers = #tpu.dot_dimension_numbers<[1], [0], [0], [1], [0, 0, 1, 1], [], []>} : vector<512x8xf32>, vector<8x128xf32>, vector<512x128xf32> -> vector<512x128xf32>
    %c0_3 = arith.constant 0 : index
    %c0_4 = arith.constant 0 : index
    %3 = vector.load %arg3[%c0_3, %c0_4] : memref<512x128xf32, #tpu.memory_space<vmem>>, vector<512x128xf32>
    tpu.vector_store %arg3[%c0_3, %c0_4], %2 {strides = array<i32>} : memref<512x128xf32, #tpu.memory_space<vmem>>, vector<512x128xf32>,
    return
  }
  func.func @transform_0(%arg0: i32) -> (i32, i32) {
    %c0_i32 = arith.constant 0 : i32
    %c0_i32_0 = arith.constant 0 : i32
    return %arg0, %c0_i32 : i32, i32
  }
  func.func @transform_1(%arg0: i32) -> (i32, i32) {
    %c0_i32 = arith.constant 0 : i32
    %c0_i32_0 = arith.constant 0 : i32
    %c0_i32_1 = arith.constant 0 : i32
    return %c0_i32, %c0_i32_0 : i32, i32
  }
  func.func @transform_2(%arg0: i32) -> (i32, i32) {
    %c0_i32 = arith.constant 0 : i32
    %c0_i32_0 = arith.constant 0 : i32
    return %arg0, %c0_i32 : i32, i32
  }
}

</mosaic_0001>

<bundles_post_ra>
// kernel: tpu_custom_call.1
= control target key start
LH: loop header
LB: loop body
LE: loop exit
PB: predicated region body
PF: predicated region fallthrough
CT: control target
= control target key end

     0   :  { %vm77_vm0 = vcmask 64512   ;;  %s1280_s0 = inlined_call_operand.vmem [shape: f32[512,8], index: 0, kind: input, shape index: {}]   ;;  %s1281_s1 = inlined_call_operand.vmem [shape: f32[8,128], index: 1, kind: input, shape index: {}]   ;;  %s1282_s2 = inlined_call_operand.hbm [shape: f32[512,128], index: 2, kind: output, shape index: {}]  }
   0x1   :  { %v76_v0 = vld [vmem:[%s1281_s1] sm:$0xff]  ;;  %v13_v3 = vld [vmem:[%s1280_s0 + $0x8] sm:$0xff]  ;;  %v14_v5 = vld [vmem:[%s1280_s0 + $0x10] sm:$0xff] }
   0x2   :  { %v12_v1 = vld [vmem:[%s1280_s0] sm:$0xff]  ;;  %864 = vmatprep.subr.mxu0 %v76_v0  ;;  %962 = vmatprep.subr.mxu1 %v76_v0  ;;  %v45_v4 = vld [vmem:[%s1280_s0 + $0x108] sm:$0xff]  ;;  %v46_v6 = vld [vmem:[%s1280_s0 + $0x110] sm:$0xff] }
   0x3   :  { %v44_v2 = vld [vmem:[%s1280_s0 + $0x100] sm:$0xff]  ;;  %865 = vmatpush3.msra.mxu0 %v76_v0  ;;  %963 = vmatpush3.msra.mxu1 %v76_v0  ;;  %v15_v7 = vld [vmem:[%s1280_s0 + $0x18] sm:$0xff]  ;;  %v17_v11 = vld [vmem:[%s1280_s0 + $0x28] sm:$0xff] }
   0x4   :  { %866 = vmatprep.mubr.msk.f32.mxu0 %vm77_vm0, %v12_v1  ;;  %914 = vmatprep.mubr.msk.f32.mxu1 %vm77_vm0, %v44_v2  ;;  %v47_v8 = vld [vmem:[%s1280_s0 + $0x118] sm:$0xff]  ;;  %v16_v9 = vld [vmem:[%s1280_s0 + $0x20] sm:$0xff]  ;;  %v49_v12 = vld [vmem:[%s1280_s0 + $0x128] sm:$0xff] }
   0x5   :  { %867 = vmatmul.mubr.msk.f32.vlgmr.msra.gmra.mrb[0].mxu0 %vm77_vm0, %v13_v3  ;;  %915 = vmatmul.mubr.msk.f32.vlgmr.msra.gmra.mrb[0].mxu1 %vm77_vm0, %v45_v4  ;;  %v48_v10 = vld [vmem:[%s1280_s0 + $0x120] sm:$0xff]  ;;  %v18_v13 = vld [vmem:[%s1280_s0 + $0x30] sm:$0xff]  ;;  %v19_v15 = vld [vmem:[%s1280_s0 + $0x38] sm:$0xff] }
   0x6   :  { %869 = vmatprep.mubr.msk.f32.mxu0 %vm77_vm0, %v14_v5  ;;  %917 = vmatprep.mubr.msk.f32.mxu1 %vm77_vm0, %v46_v6  ;;  %v50_v14 = vld [vmem:[%s1280_s0 + $0x130] sm:$0xff]  ;;  %v51_v16 = vld [vmem:[%s1280_s0 + $0x138] sm:$0xff]  ;;  %v20_v17 = vld [vmem:[%s1280_s0 + $0x40] sm:$0xff] }
   0x7   :  { %v52_v18 = vld [vmem:[%s1280_s0 + $0x140] sm:$0xff]  ;;  %v21_v19 = vld [vmem:[%s1280_s0 + $0x48] sm:$0xff]  ;;  %v22_v21 = vld [vmem:[%s1280_s0 + $0x50] sm:$0xff] }
   0x8   :  { %v53_v20 = vld [vmem:[%s1280_s0 + $0x148] sm:$0xff]  ;;  %v54_v22 = vld [vmem:[%s1280_s0 + $0x150] sm:$0xff]  ;;  %v23_v23 = vld [vmem:[%s1280_s0 + $0x58] sm:$0xff] }
   0x9   :  { %870 = vmatmul.mubr.msk.f32.gmra.mrb[2].mxu0 %vm77_vm0, %v15_v7  ;;  %918 = vmatmul.mubr.msk.f32.gmra.mrb[2].mxu1 %vm77_vm0, %v47_v8  ;;  %v55_v24 = vld [vmem:[%s1280_s0 + $0x158] sm:$0xff] }
   0xa   :  { %872 = vmatprep.mubr.msk.f32.mxu0 %vm77_vm0, %v16_v9  ;;  %920 = vmatprep.mubr.msk.f32.mxu1 %vm77_vm0, %v48_v10 }
   0xd   :  { %873 = vmatmul.mubr.msk.f32.gmra.mrb[4].mxu0 %vm77_vm0, %v17_v11  ;;  %921 = vmatmul.mubr.msk.f32.gmra.mrb[4].mxu1 %vm77_vm0, %v49_v12 }
   0xe   :  { %875 = vmatprep.mubr.msk.f32.mxu0 %vm77_vm0, %v18_v13  ;;  %923 = vmatprep.mubr.msk.f32.mxu1 %vm77_vm0, %v50_v14 }
  0x11   :  { %876 = vmatmul.mubr.msk.f32.gmra.mrb[6].mxu0 %vm77_vm0, %v19_v15  ;;  %924 = vmatmul.mubr.msk.f32.gmra.mrb[6].mxu1 %vm77_vm0, %v51_v16 }
  0x12   :  { %878 = vmatprep.mubr.msk.f32.mxu0 %vm77_vm0, %v20_v17  ;;  %926 = vmatprep.mubr.msk.f32.mxu1 %vm77_vm0, %v52_v18 }
  0x15   :  { %879 = vmatmul.mubr.msk.f32.gmra.mrb[8].mxu0 %vm77_vm0, %v21_v19  ;;  %927 = vmatmul.mubr.msk.f32.gmra.mrb[8].mxu1 %vm77_vm0, %v53_v20 }
  0x16   :  { %881 = vmatprep.mubr.msk.f32.mxu0 %vm77_vm0, %v22_v21  ;;  %929 = vmatprep.mubr.msk.f32.mxu1 %vm77_vm0, %v54_v22 }
  0x17   :  { %7 = vsyncpa [#allocation3], 0  ;;  %v24_v25 = vld [vmem:[%s1280_s0 + $0x60] sm:$0xff]  ;;  %v25_v27 = vld [vmem:[%s1280_s0 + $0x68] sm:$0xff] }
  0x18   :  { %v56_v26 = vld [vmem:[%s1280_s0 + $0x160] sm:$0xff]  ;;  %v57_v28 = vld [vmem:[%s1280_s0 + $0x168] sm:$0xff]  ;;  %v26_v29 = vld [vmem:[%s1280_s0 + $0x70] sm:$0xff] }
  0x19   :  { %882 = vmatmul.mubr.msk.f32.gmra.mrb[10].mxu0 %vm77_vm0, %v23_v23  ;;  %930 = vmatmul.mubr.msk.f32.gmra.mrb[10].mxu1 %vm77_vm0, %v55_v24  ;;  %v58_v30 = vld [vmem:[%s1280_s0 + $0x170] sm:$0xff]  ;;  %v27_v31 = vld [vmem:[%s1280_s0 + $0x78] sm:$0xff]  ;;  %v28_v33 = vld [vmem:[%s1280_s0 + $0x80] sm:$0xff] }
  0x1a   :  { %884 = vmatprep.mubr.msk.f32.mxu0 %vm77_vm0, %v24_v25  ;;  %932 = vmatprep.mubr.msk.f32.mxu1 %vm77_vm0, %v56_v26  ;;  %v59_v32 = vld [vmem:[%s1280_s0 + $0x178] sm:$0xff]  ;;  %v60_v34 = vld [vmem:[%s1280_s0 + $0x180] sm:$0xff]  ;;  %v29_v35 = vld [vmem:[%s1280_s0 + $0x88] sm:$0xff] }
  0x1b   :  { %v61_v36 = vld [vmem:[%s1280_s0 + $0x188] sm:$0xff]  ;;  %v30_v37 = vld [vmem:[%s1280_s0 + $0x90] sm:$0xff]  ;;  %v31_v39 = vld [vmem:[%s1280_s0 + $0x98] sm:$0xff] }
  0x1c   :  { %v62_v38 = vld [vmem:[%s1280_s0 + $0x190] sm:$0xff]  ;;  %v63_v40 = vld [vmem:[%s1280_s0 + $0x198] sm:$0xff]  ;;  %v32_v41 = vld [vmem:[%s1280_s0 + $0xa0] sm:$0xff] }
  0x1d   :  { %885 = vmatmul.mubr.msk.f32.gmra.mrb[12].mxu0 %vm77_vm0, %v25_v27  ;;  %933 = vmatmul.mubr.msk.f32.gmra.mrb[12].mxu1 %vm77_vm0, %v57_v28  ;;  %v64_v42 = vld [vmem:[%s1280_s0 + $0x1a0] sm:$0xff]  ;;  %v33_v43 = vld [vmem:[%s1280_s0 + $0xa8] sm:$0xff]  ;;  %v34_v45 = vld [vmem:[%s1280_s0 + $0xb0] sm:$0xff] }
  0x1e   :  { %887 = vmatprep.mubr.msk.f32.mxu0 %vm77_vm0, %v26_v29  ;;  %935 = vmatprep.mubr.msk.f32.mxu1 %vm77_vm0, %v58_v30  ;;  %v65_v44 = vld [vmem:[%s1280_s0 + $0x1a8] sm:$0xff]  ;;  %v66_v46 = vld [vmem:[%s1280_s0 + $0x1b0] sm:$0xff]  ;;  %v35_v47 = vld [vmem:[%s1280_s0 + $0xb8] sm:$0xff] }
  0x1f   :  { %v67_v48 = vld [vmem:[%s1280_s0 + $0x1b8] sm:$0xff]  ;;  %v36_v49 = vld [vmem:[%s1280_s0 + $0xc0] sm:$0xff]  ;;  %v37_v51 = vld [vmem:[%s1280_s0 + $0xc8] sm:$0xff] }
  0x20   :  { %v68_v50 = vld [vmem:[%s1280_s0 + $0x1c0] sm:$0xff]  ;;  %v69_v52 = vld [vmem:[%s1280_s0 + $0x1c8] sm:$0xff]  ;;  %v38_v53 = vld [vmem:[%s1280_s0 + $0xd0] sm:$0xff] }
  0x21   :  { %888 = vmatmul.mubr.msk.f32.gmra.mrb[14].mxu0 %vm77_vm0, %v27_v31  ;;  %936 = vmatmul.mubr.msk.f32.gmra.mrb[14].mxu1 %vm77_vm0, %v59_v32  ;;  %v70_v54 = vld [vmem:[%s1280_s0 + $0x1d0] sm:$0xff]  ;;  %v39_v55 = vld [vmem:[%s1280_s0 + $0xd8] sm:$0xff]  ;;  %v40_v57 = vld [vmem:[%s1280_s0 + $0xe0] sm:$0xff] }
  0x22   :  { %890 = vmatprep.mubr.msk.f32.mxu0 %vm77_vm0, %v28_v33  ;;  %938 = vmatprep.mubr.msk.f32.mxu1 %vm77_vm0, %v60_v34  ;;  %v71_v56 = vld [vmem:[%s1280_s0 + $0x1d8] sm:$0xff]  ;;  %v72_v58 = vld [vmem:[%s1280_s0 + $0x1e0] sm:$0xff]  ;;  %v41_v59 = vld [vmem:[%s1280_s0 + $0xe8] sm:$0xff] }
  0x23   :  { %v73_v60 = vld [vmem:[%s1280_s0 + $0x1e8] sm:$0xff]  ;;  %v42_v61 = vld [vmem:[%s1280_s0 + $0xf0] sm:$0xff]  ;;  %v43_v63 = vld [vmem:[%s1280_s0 + $0xf8] sm:$0xff] }
  0x24   :  { %v74_v62 = vld [vmem:[%s1280_s0 + $0x1f0] sm:$0xff]  ;;  %v75_v0 = vld [vmem:[%s1280_s0 + $0x1f8] sm:$0xff]  ;;  %s991_s0 = smov [#allocation2]  }
  0x25   :  { %891 = vmatmul.mubr.msk.f32.gmra.mrb[16].mxu0 %vm77_vm0, %v29_v35  ;;  %939 = vmatmul.mubr.msk.f32.gmra.mrb[16].mxu1 %vm77_vm0, %v61_v36  ;;  %s724_s22 = sshll.u32 %s991_s0, 4  ;;  %s725_s22 = int_to_ptr.vmem [resolvable:$true] %s724_s22 }
  0x26   :  { %893 = vmatprep.mubr.msk.f32.mxu0 %vm77_vm0, %v30_v37  ;;  %941 = vmatprep.mubr.msk.f32.mxu1 %vm77_vm0, %v62_v38  ;;  %s967_s23 = scalar_lea.vmem %s725_s22, 8192  ;;  %p972_p1 = scmp.lt.s32.totalorder %s725_s22, %s725_s22 }
  0x27   :  { %p968_p0 = scmp.ne.s32.totalorder %s725_s22, %s967_s23  ;;  %p973_p2 = scmp.lt.s32.totalorder %s967_s23, %s967_s23 }
  0x29   :  { %894 = vmatmul.mubr.msk.f32.gmra.mrb[18].mxu0 %vm77_vm0, %v31_v39  ;;  %942 = vmatmul.mubr.msk.f32.gmra.mrb[18].mxu1 %vm77_vm0, %v63_v40  ;;  %p974_p3 = por %p973_p2, %p972_p1 }
  0x2a   :  { %896 = vmatprep.mubr.msk.f32.mxu0 %vm77_vm0, %v32_v41  ;;  %944 = vmatprep.mubr.msk.f32.mxu1 %vm77_vm0, %v64_v42 }
  0x2b   :  { %p975_p4 = pnand %p974_p3, %p968_p0 }
  0x2d   :  { %897 = vmatmul.mubr.msk.f32.gmra.mrb[20].mxu0 %vm77_vm0, %v33_v43  ;;  %945 = vmatmul.mubr.msk.f32.gmra.mrb[20].mxu1 %vm77_vm0, %v65_v44 }
  0x2e   :  { %899 = vmatprep.mubr.msk.f32.mxu0 %vm77_vm0, %v34_v45  ;;  %947 = vmatprep.mubr.msk.f32.mxu1 %vm77_vm0, %v66_v46 }
  0x31   :  { %900 = vmatmul.mubr.msk.f32.gmra.mrb[22].mxu0 %vm77_vm0, %v35_v47  ;;  %948 = vmatmul.mubr.msk.f32.gmra.mrb[22].mxu1 %vm77_vm0, %v67_v48 }
  0x32   :  { %902 = vmatprep.mubr.msk.f32.mxu0 %vm77_vm0, %v36_v49  ;;  %950 = vmatprep.mubr.msk.f32.mxu1 %vm77_vm0, %v68_v50 }
  0x35   :  { %903 = vmatmul.mubr.msk.f32.gmra.mrb[24].mxu0 %vm77_vm0, %v37_v51  ;;  %951 = vmatmul.mubr.msk.f32.gmra.mrb[24].mxu1 %vm77_vm0, %v69_v52 }
  0x36   :  { %905 = vmatprep.mubr.msk.f32.mxu0 %vm77_vm0, %v38_v53  ;;  %953 = vmatprep.mubr.msk.f32.mxu1 %vm77_vm0, %v70_v54 }
  0x39   :  { %906 = vmatmul.mubr.msk.f32.gmra.mrb[26].mxu0 %vm77_vm0, %v39_v55  ;;  %954 = vmatmul.mubr.msk.f32.gmra.mrb[26].mxu1 %vm77_vm0, %v71_v56 }
  0x3a   :  { %908 = vmatprep.mubr.msk.f32.mxu0 %vm77_vm0, %v40_v57  ;;  %956 = vmatprep.mubr.msk.f32.mxu1 %vm77_vm0, %v72_v58 }
  0x3d   :  { %909 = vmatmul.mubr.msk.f32.gmra.mrb[28].mxu0 %vm77_vm0, %v41_v59  ;;  %957 = vmatmul.mubr.msk.f32.gmra.mrb[28].mxu1 %vm77_vm0, %v73_v60 }
  0x3e   :  { %911 = vmatprep.mubr.msk.f32.mxu0 %vm77_vm0, %v42_v61  ;;  %959 = vmatprep.mubr.msk.f32.mxu1 %vm77_vm0, %v74_v62 }
  0x41   :  { %912 = vmatmul.mubr.msk.f32.gmra.mrb[30].mxu0 %vm77_vm0, %v43_v63  ;;  %960 = vmatmul.mubr.msk.f32.gmra.mrb[30].mxu1 %vm77_vm0, %v75_v0 }
  0xd8   :  { %v868_v1 = vpop.f32.mrb[0].mxu0  ;;  %v916_v2 = vpop.f32.mrb[0].mxu1 }
  0xd9   :  { %656 = vst [vmem:[#allocation2 + $0x8] sm:$0xff] %v868_v1  ;;  %688 = vst [vmem:[#allocation2 + $0x108] sm:$0xff] %v916_v2  ;;  %v336_v3 = vpop.f32.mrb[1].mxu0  ;;  %v496_v4 = vpop.f32.mrb[1].mxu1 }
  0xda   :  { %655 = vst [vmem:[#allocation2] sm:$0xff] %v336_v3  ;;  %687 = vst [vmem:[#allocation2 + $0x100] sm:$0xff] %v496_v4 }
  0xdc   :  { %v871_v5 = vpop.f32.mrb[2].mxu0  ;;  %v919_v6 = vpop.f32.mrb[2].mxu1 }
  0xdd   :  { %658 = vst [vmem:[#allocation2 + $0x18] sm:$0xff] %v871_v5  ;;  %690 = vst [vmem:[#allocation2 + $0x118] sm:$0xff] %v919_v6  ;;  %v346_v7 = vpop.f32.mrb[3].mxu0  ;;  %v506_v8 = vpop.f32.mrb[3].mxu1 }
  0xde   :  { %657 = vst [vmem:[#allocation2 + $0x10] sm:$0xff] %v346_v7  ;;  %689 = vst [vmem:[#allocation2 + $0x110] sm:$0xff] %v506_v8 }
  0xe0   :  { %v874_v9 = vpop.f32.mrb[4].mxu0  ;;  %v922_v10 = vpop.f32.mrb[4].mxu1 }
  0xe1   :  { %660 = vst [vmem:[#allocation2 + $0x28] sm:$0xff] %v874_v9  ;;  %692 = vst [vmem:[#allocation2 + $0x128] sm:$0xff] %v922_v10  ;;  %v356_v11 = vpop.f32.mrb[5].mxu0  ;;  %v516_v12 = vpop.f32.mrb[5].mxu1 }
  0xe2   :  { %659 = vst [vmem:[#allocation2 + $0x20] sm:$0xff] %v356_v11  ;;  %691 = vst [vmem:[#allocation2 + $0x120] sm:$0xff] %v516_v12 }
  0xe4   :  { %v877_v13 = vpop.f32.mrb[6].mxu0  ;;  %v925_v14 = vpop.f32.mrb[6].mxu1 }
  0xe5   :  { %662 = vst [vmem:[#allocation2 + $0x38] sm:$0xff] %v877_v13  ;;  %694 = vst [vmem:[#allocation2 + $0x138] sm:$0xff] %v925_v14  ;;  %v366_v15 = vpop.f32.mrb[7].mxu0  ;;  %v526_v16 = vpop.f32.mrb[7].mxu1 }
  0xe6   :  { %661 = vst [vmem:[#allocation2 + $0x30] sm:$0xff] %v366_v15  ;;  %693 = vst [vmem:[#allocation2 + $0x130] sm:$0xff] %v526_v16 }
  0xe8   :  { %v880_v17 = vpop.f32.mrb[8].mxu0  ;;  %v928_v18 = vpop.f32.mrb[8].mxu1 }
  0xe9   :  { %664 = vst [vmem:[#allocation2 + $0x48] sm:$0xff] %v880_v17  ;;  %696 = vst [vmem:[#allocation2 + $0x148] sm:$0xff] %v928_v18  ;;  %v376_v19 = vpop.f32.mrb[9].mxu0  ;;  %v536_v20 = vpop.f32.mrb[9].mxu1 }
  0xea   :  { %663 = vst [vmem:[#allocation2 + $0x40] sm:$0xff] %v376_v19  ;;  %695 = vst [vmem:[#allocation2 + $0x140] sm:$0xff] %v536_v20 }
  0xec   :  { %v883_v21 = vpop.f32.mrb[10].mxu0  ;;  %v931_v22 = vpop.f32.mrb[10].mxu1 }
  0xed   :  { %666 = vst [vmem:[#allocation2 + $0x58] sm:$0xff] %v883_v21  ;;  %698 = vst [vmem:[#allocation2 + $0x158] sm:$0xff] %v931_v22  ;;  %v386_v23 = vpop.f32.mrb[11].mxu0  ;;  %v546_v24 = vpop.f32.mrb[11].mxu1 }
  0xee   :  { %665 = vst [vmem:[#allocation2 + $0x50] sm:$0xff] %v386_v23  ;;  %697 = vst [vmem:[#allocation2 + $0x150] sm:$0xff] %v546_v24 }
  0xf0   :  { %v886_v25 = vpop.f32.mrb[12].mxu0  ;;  %v934_v26 = vpop.f32.mrb[12].mxu1 }
  0xf1   :  { %668 = vst [vmem:[#allocation2 + $0x68] sm:$0xff] %v886_v25  ;;  %700 = vst [vmem:[#allocation2 + $0x168] sm:$0xff] %v934_v26  ;;  %v396_v27 = vpop.f32.mrb[13].mxu0  ;;  %v556_v28 = vpop.f32.mrb[13].mxu1 }
  0xf2   :  { %667 = vst [vmem:[#allocation2 + $0x60] sm:$0xff] %v396_v27  ;;  %699 = vst [vmem:[#allocation2 + $0x160] sm:$0xff] %v556_v28 }
  0xf4   :  { %v889_v29 = vpop.f32.mrb[14].mxu0  ;;  %v937_v30 = vpop.f32.mrb[14].mxu1 }
  0xf5   :  { %670 = vst [vmem:[#allocation2 + $0x78] sm:$0xff] %v889_v29  ;;  %702 = vst [vmem:[#allocation2 + $0x178] sm:$0xff] %v937_v30  ;;  %v406_v31 = vpop.f32.mrb[15].mxu0  ;;  %v566_v32 = vpop.f32.mrb[15].mxu1 }
  0xf6   :  { %669 = vst [vmem:[#allocation2 + $0x70] sm:$0xff] %v406_v31  ;;  %701 = vst [vmem:[#allocation2 + $0x170] sm:$0xff] %v566_v32 }
  0xf8   :  { %v892_v33 = vpop.f32.mrb[16].mxu0  ;;  %v940_v34 = vpop.f32.mrb[16].mxu1 }
  0xf9   :  { %672 = vst [vmem:[#allocation2 + $0x88] sm:$0xff] %v892_v33  ;;  %704 = vst [vmem:[#allocation2 + $0x188] sm:$0xff] %v940_v34  ;;  %v416_v35 = vpop.f32.mrb[17].mxu0  ;;  %v576_v36 = vpop.f32.mrb[17].mxu1 }
  0xfa   :  { %671 = vst [vmem:[#allocation2 + $0x80] sm:$0xff] %v416_v35  ;;  %703 = vst [vmem:[#allocation2 + $0x180] sm:$0xff] %v576_v36 }
  0xfc   :  { %v895_v37 = vpop.f32.mrb[18].mxu0  ;;  %v943_v38 = vpop.f32.mrb[18].mxu1 }
  0xfd   :  { %674 = vst [vmem:[#allocation2 + $0x98] sm:$0xff] %v895_v37  ;;  %706 = vst [vmem:[#allocation2 + $0x198] sm:$0xff] %v943_v38  ;;  %v426_v39 = vpop.f32.mrb[19].mxu0  ;;  %v586_v40 = vpop.f32.mrb[19].mxu1 }
  0xfe   :  { %673 = vst [vmem:[#allocation2 + $0x90] sm:$0xff] %v426_v39  ;;  %705 = vst [vmem:[#allocation2 + $0x190] sm:$0xff] %v586_v40 }
 0x100   :  { %v898_v41 = vpop.f32.mrb[20].mxu0  ;;  %v946_v42 = vpop.f32.mrb[20].mxu1 }
 0x101   :  { %676 = vst [vmem:[#allocation2 + $0xa8] sm:$0xff] %v898_v41  ;;  %708 = vst [vmem:[#allocation2 + $0x1a8] sm:$0xff] %v946_v42  ;;  %v436_v43 = vpop.f32.mrb[21].mxu0  ;;  %v596_v44 = vpop.f32.mrb[21].mxu1 }
 0x102   :  { %675 = vst [vmem:[#allocation2 + $0xa0] sm:$0xff] %v436_v43  ;;  %707 = vst [vmem:[#allocation2 + $0x1a0] sm:$0xff] %v596_v44 }
 0x104   :  { %v901_v45 = vpop.f32.mrb[22].mxu0  ;;  %v949_v46 = vpop.f32.mrb[22].mxu1 }
 0x105   :  { %678 = vst [vmem:[#allocation2 + $0xb8] sm:$0xff] %v901_v45  ;;  %710 = vst [vmem:[#allocation2 + $0x1b8] sm:$0xff] %v949_v46  ;;  %v446_v47 = vpop.f32.mrb[23].mxu0  ;;  %v606_v48 = vpop.f32.mrb[23].mxu1 }
 0x106   :  { %677 = vst [vmem:[#allocation2 + $0xb0] sm:$0xff] %v446_v47  ;;  %709 = vst [vmem:[#allocation2 + $0x1b0] sm:$0xff] %v606_v48 }
 0x108   :  { %v904_v49 = vpop.f32.mrb[24].mxu0  ;;  %v952_v50 = vpop.f32.mrb[24].mxu1 }
 0x109   :  { %680 = vst [vmem:[#allocation2 + $0xc8] sm:$0xff] %v904_v49  ;;  %712 = vst [vmem:[#allocation2 + $0x1c8] sm:$0xff] %v952_v50  ;;  %v456_v51 = vpop.f32.mrb[25].mxu0  ;;  %v616_v52 = vpop.f32.mrb[25].mxu1 }
 0x10a   :  { %679 = vst [vmem:[#allocation2 + $0xc0] sm:$0xff] %v456_v51  ;;  %711 = vst [vmem:[#allocation2 + $0x1c0] sm:$0xff] %v616_v52 }
 0x10c   :  { %v907_v53 = vpop.f32.mrb[26].mxu0  ;;  %v955_v54 = vpop.f32.mrb[26].mxu1 }
 0x10d   :  { %682 = vst [vmem:[#allocation2 + $0xd8] sm:$0xff] %v907_v53  ;;  %714 = vst [vmem:[#allocation2 + $0x1d8] sm:$0xff] %v955_v54  ;;  %v466_v55 = vpop.f32.mrb[27].mxu0  ;;  %v626_v56 = vpop.f32.mrb[27].mxu1 }
 0x10e   :  { %681 = vst [vmem:[#allocation2 + $0xd0] sm:$0xff] %v466_v55  ;;  %713 = vst [vmem:[#allocation2 + $0x1d0] sm:$0xff] %v626_v56 }
 0x110   :  { %v910_v57 = vpop.f32.mrb[28].mxu0  ;;  %v958_v58 = vpop.f32.mrb[28].mxu1 }
 0x111   :  { %684 = vst [vmem:[#allocation2 + $0xe8] sm:$0xff] %v910_v57  ;;  %716 = vst [vmem:[#allocation2 + $0x1e8] sm:$0xff] %v958_v58  ;;  %v476_v59 = vpop.f32.mrb[29].mxu0  ;;  %v636_v60 = vpop.f32.mrb[29].mxu1 }
 0x112   :  { %683 = vst [vmem:[#allocation2 + $0xe0] sm:$0xff] %v476_v59  ;;  %715 = vst [vmem:[#allocation2 + $0x1e0] sm:$0xff] %v636_v60 }
 0x114   :  { %v913_v61 = vpop.f32.mrb[30].mxu0  ;;  %v961_v62 = vpop.f32.mrb[30].mxu1 }
 0x115   :  { %686 = vst [vmem:[#allocation2 + $0xf8] sm:$0xff] %v913_v61  ;;  %718 = vst [vmem:[#allocation2 + $0x1f8] sm:$0xff] %v961_v62  ;;  %v486_v63 = vpop.f32.mrb[31].mxu0  ;;  %v646_v0 = vpop.f32.mrb[31].mxu1 }
 0x116   :  { %685 = vst [vmem:[#allocation2 + $0xf0] sm:$0xff] %v486_v63  ;;  %717 = vst [vmem:[#allocation2 + $0x1f0] sm:$0xff] %v646_v0 }
 0x117   :  { %978 = shalt.err (!%p975_p4)
}
 0x118   :  { %s979_s26 = scalar_lea.hbm %s1282_s2, 8192 }
 0x119   :  { %p980_p5 = scmp.ne.s32.totalorder %s1282_s2, %s979_s26  ;;  %p983_p6 = scmp.lt.u32.totalorder %s979_s26, %s1282_s2 }
 0x11b   :  { %p985_p7 = pnand %p983_p6, %p980_p5 }
 0x11d   :  { %988 = shalt.err (!%p985_p7)
}
 0x11e   :  { %s992_s3 = smov 128   ;;  %s993_s4 = smov 8  }
 0x11f   :  { %730 = dma.vmem_to_hbm [thread:$0]  %s725_s22, 8192, %s1282_s2, [#allocation3], %s992_s3, %s992_s3, %s993_s4  }
 0x120   :  { %989 = dma.done.wait [#allocation3], 8192  }
 0x121   :  { %990 = vsyncadd [#allocation3], 4294959104 }
 0x122   :  { %734 = vsyncpa [#allocation3], 1 }

</bundles_post_ra>
